<compile_context>
chip_gen: v7x
topology: tpu7x:2x2x1
jax: 0.10.0
libtpu: 0.0.40
codegen_flags: <defaults>
</compile_context>

<pallas_src>
import numpy as np
import jax
import jax.numpy as jnp
from jax.experimental import pallas as pl
from jax.experimental.pallas import tpu as pltpu


def _mixup_kernel(idx_ref, lam_ref, x_ref, xperm_ref, o_ref):
    # idx_ref: scalar-prefetched permutation (consumed by the index_maps only)
    # lam_ref: (1,) f32 in SMEM
    del idx_ref
    lam = lam_ref[0]                              # f32 scalar
    x = x_ref[...].astype(jnp.float32)            # (Rt, C)
    xp = xperm_ref[...].astype(jnp.float32)       # (Rt, C), gathered row block
    o_ref[...] = (lam * x + (1.0 - lam) * xp).astype(o_ref.dtype)


def _sublane_tile(dtype):
    """Packed sublane tile for the dtype: 8 (f32), 16 (bf16/f16), 32 (int8/fp8)."""
    itemsize = jnp.dtype(dtype).itemsize
    return max(8, 32 // itemsize)


def _choose_row_tile(R, row_bytes, sublane, max_block_bytes):
    """Fixed row tile: largest multiple of `sublane` whose block fits the budget.

    Used with a cdiv grid, so Rt does NOT need to divide R (the partial last
    tile is masked by Pallas).  If the whole R fits, take it (one r-tile).
    """
    max_rows = max_block_bytes // max(row_bytes, 1)
    max_rows = max(sublane, (max_rows // sublane) * sublane)
    return min(R, max_rows)


def mixup_pallas(x, lam, index, *, max_block_bytes=4 << 20):
    """x: (B, ...) float array; lam: python float; index: (B,) int permutation."""
    B = x.shape[0]
    orig_shape = x.shape
    feat = x.reshape(B, -1)
    N = feat.shape[1]
    dtype = feat.dtype
    itemsize = jnp.dtype(dtype).itemsize

    padded = False
    if N % 128 == 0:
        # Common case: lane-aligned feature size -> (B, R, 128) slab, no pad.
        C = 128
        R = N // 128
    elif N * itemsize <= max_block_bytes:
        # Unaligned but small enough: whole feature row as one block via the
        # "block dim equals full array dim" exemption -> no pad/slice passes.
        C = N
        R = 1
    else:
        # Huge, unaligned feature dim: pad once to the lane width.
        # TODO(synk): replace with an in-kernel masked tail store to avoid the
        # extra pad/slice HBM passes for this rare shape class.
        pad = (-N) % 128
        feat = jnp.pad(feat, ((0, 0), (0, pad)))
        C = 128
        R = (N + pad) // 128
        padded = True

    feat3 = feat.reshape(B, R, C)

    sublane = _sublane_tile(dtype)
    Rt = _choose_row_tile(R, C * itemsize, sublane, max_block_bytes)
    num_r = pl.cdiv(R, Rt)          # cdiv grid: partial last r-tile is masked

    lam_arr = jnp.asarray([lam], dtype=jnp.float32)   # f32 SMEM scalar
    idx_arr = jnp.asarray(index, dtype=jnp.int32)

    blk = (None, Rt, C)             # batch dim squeezed -> kernel refs are 2-D

    grid_spec = pltpu.PrefetchScalarGridSpec(
        num_scalar_prefetch=1,                    # permutation lands in SMEM
        grid=(B, num_r),
        in_specs=[
            pl.BlockSpec(memory_space=pltpu.MemorySpace.SMEM),       # lam (f32)
            pl.BlockSpec(blk, lambda b, r, idx: (b, r, 0)),          # x[b]
            pl.BlockSpec(blk, lambda b, r, idx: (idx[b], r, 0)),     # x[index[b]]
        ],
        out_specs=pl.BlockSpec(blk, lambda b, r, idx: (b, r, 0)),
    )

    # VMEM budget: 3 arrays x 2 pipeline buffers + headroom; explicit so the
    # block size is also valid on v5e's smaller default scoped VMEM, and
    # bounded by 32 MiB (within every chip's physical VMEM, incl. v7x).
    block_bytes = Rt * C * itemsize
    vmem_limit = min(32 << 20, max(16 << 20, 6 * block_bytes + (4 << 20)))

    # Pure HBM-bandwidth-bound elementwise blend: 2 reads + 1 write per element.
    cost = pl.CostEstimate(
        flops=3 * B * R * C,
        transcendentals=0,
        bytes_accessed=3 * B * R * C * itemsize,
    )

    out = pl.pallas_call(
        _mixup_kernel,
        out_shape=jax.ShapeDtypeStruct((B, R, C), dtype),
        grid_spec=grid_spec,
        compiler_params=pltpu.CompilerParams(
            dimension_semantics=("parallel", "parallel"),
            vmem_limit_bytes=vmem_limit),
        cost_estimate=cost,
    )(idx_arr, lam_arr, feat3, feat3)

    out = out.reshape(B, R * C)
    if padded:
        out = out[:, :N]
    return out.reshape(orig_shape)


if __name__ == "__main__":
    # Mixup has no learnable parameters (alpha is a hyperparameter).
    alpha = 1.0

    key = jax.random.PRNGKey(0)
    kx, kperm = jax.random.split(key)

    # Small NCHW-style input, e.g. a batch of spectrogram-like features.
    B, C, H, W = 2, 4, 16, 16
    x = jax.random.normal(kx, (B, C, H, W), dtype=jnp.float32)

    # lam ~ Beta(alpha, alpha), sampled host-side (like np.random.beta in torch).
    lam = float(np.random.default_rng(0).beta(alpha, alpha)) if alpha > 0.0 else 1.0
    # index = randperm(batch_size)
    index = jax.random.permutation(kperm, B)

    out = jax.block_until_ready(mixup_pallas(x, lam, index))
    ref = lam * x + (1.0 - lam) * x[index]
    np.testing.assert_allclose(np.asarray(out), np.asarray(ref), rtol=1e-6, atol=1e-6)

    # Ragged feature size (N = 105): exercises the no-pad whole-row block path.
    x2 = jax.random.normal(kx, (B, 3, 5, 7), dtype=jnp.float32)
    out2 = jax.block_until_ready(mixup_pallas(x2, lam, index))
    ref2 = lam * x2 + (1.0 - lam) * x2[index]
    np.testing.assert_allclose(np.asarray(out2), np.asarray(ref2), rtol=1e-6, atol=1e-6)

    print("KERNEL_OK")
</pallas_src>

<mosaic_0001>
module attributes {stable_mosaic.version = 11 : i64} {
  func.func @_mixup_kernel(%arg0: i32, %arg1: i32, %arg2: memref<2xi32, #tpu.memory_space<smem>>, %arg3: memref<1xf32, #tpu.memory_space<smem>>, %arg4: memref<1x8x128xf32, #tpu.memory_space<vmem>>, %arg5: memref<1x8x128xf32, #tpu.memory_space<vmem>>, %arg6: memref<1x8x128xf32, #tpu.memory_space<vmem>>) attributes {dimension_semantics = [#tpu.dimension_semantics<parallel>, #tpu.dimension_semantics<parallel>], iteration_bounds = array<i64: 2, 1>, scalar_prefetch = 1 : i64, scratch_operands = 0 : i64, tpu.core_type = #tpu.core_type<tc>, window_params = [{transform_indices = @transform_0, window_bounds = array<i64: 1>}, {transform_indices = @transform_1, window_bounds = array<i64: 1, 8, 128>}, {transform_indices = @transform_2, window_bounds = array<i64: 1, 8, 128>}, {transform_indices = @transform_3, window_bounds = array<i64: 1, 8, 128>}]} {
    %c0 = arith.constant 0 : index
    %0 = memref.load %arg3[%c0] : memref<1xf32, #tpu.memory_space<smem>>
    %c0_0 = arith.constant 0 : index
    %c0_1 = arith.constant 0 : index
    %c0_2 = arith.constant 0 : index
    %1 = vector.load %arg4[%c0_0, %c0_1, %c0_2] : memref<1x8x128xf32, #tpu.memory_space<vmem>>, vector<1x8x128xf32>
    %2 = vector.shape_cast %1 : vector<1x8x128xf32> to vector<8x128xf32>
    %c0_3 = arith.constant 0 : index
    %c0_4 = arith.constant 0 : index
    %c0_5 = arith.constant 0 : index
    %3 = vector.load %arg5[%c0_3, %c0_4, %c0_5] : memref<1x8x128xf32, #tpu.memory_space<vmem>>, vector<1x8x128xf32>
    %4 = vector.shape_cast %3 : vector<1x8x128xf32> to vector<8x128xf32>
    %5 = vector.broadcast %0 : f32 to vector<8x128xf32>
    %6 = arith.mulf %5, %2 : vector<8x128xf32>
    %cst = arith.constant 1.000000e+00 : f32
    %7 = arith.subf %cst, %0 : f32
    %8 = vector.broadcast %7 : f32 to vector<8x128xf32>
    %9 = arith.mulf %8, %4 : vector<8x128xf32>
    %10 = arith.addf %6, %9 : vector<8x128xf32>
    %c0_6 = arith.constant 0 : index
    %c0_7 = arith.constant 0 : index
    %c0_8 = arith.constant 0 : index
    %11 = vector.load %arg6[%c0_6, %c0_7, %c0_8] : memref<1x8x128xf32, #tpu.memory_space<vmem>>, vector<1x8x128xf32>
    %12 = vector.shape_cast %11 : vector<1x8x128xf32> to vector<8x128xf32>
    %13 = vector.shape_cast %10 : vector<8x128xf32> to vector<1x8x128xf32>
    tpu.vector_store %arg6[%c0_6, %c0_7, %c0_8], %13 {strides = array<i32>} : memref<1x8x128xf32, #tpu.memory_space<vmem>>, vector<1x8x128xf32>,
    return
  }
  func.func @transform_0(%arg0: i32, %arg1: i32, %arg2: memref<2xi32, #tpu.memory_space<smem>>) -> i32 {
    %c0_i32 = arith.constant 0 : i32
    %c0_i32_0 = arith.constant 0 : i32
    return %c0_i32 : i32
  }
  func.func @transform_1(%arg0: i32, %arg1: i32, %arg2: memref<2xi32, #tpu.memory_space<smem>>) -> (i32, i32, i32) {
    %c0_i32 = arith.constant 0 : i32
    %c0_i32_0 = arith.constant 0 : i32
    return %arg0, %arg1, %c0_i32 : i32, i32, i32
  }
  func.func @transform_2(%arg0: i32, %arg1: i32, %arg2: memref<2xi32, #tpu.memory_space<smem>>) -> (i32, i32, i32) {
    %0 = arith.index_cast %arg0 : i32 to index
    %1 = memref.load %arg2[%0] : memref<2xi32, #tpu.memory_space<smem>>
    %c0_i32 = arith.constant 0 : i32
    %c0_i32_0 = arith.constant 0 : i32
    return %1, %arg1, %c0_i32 : i32, i32, i32
  }
  func.func @transform_3(%arg0: i32, %arg1: i32, %arg2: memref<2xi32, #tpu.memory_space<smem>>) -> (i32, i32, i32) {
    %c0_i32 = arith.constant 0 : i32
    %c0_i32_0 = arith.constant 0 : i32
    return %arg0, %arg1, %c0_i32 : i32, i32, i32
  }
}

</mosaic_0001>

<bundles_post_ra>
// kernel: tpu_custom_call.1
= control target key start
LH: loop header
LB: loop body
LE: loop exit
PB: predicated region body
PF: predicated region fallthrough
CT: control target
= control target key end

     0   :  { %s1014_s0 = inlined_call_operand.vmem [shape: s32[2], index: 0, kind: input, shape index: {}]   ;;  %s1015_s1 = inlined_call_operand.<no memory space> [shape: f32[1], index: 1, kind: input, shape index: {}]   ;;  %s1016_s2 = inlined_call_operand.hbm [shape: f32[2,8,128], index: 2, kind: input, shape index: {}]   ;;  %s1017_s3 = inlined_call_operand.hbm [shape: f32[2,8,128], index: 3, kind: input, shape index: {}]   ;;  %s1018_s4 = inlined_call_operand.hbm [shape: f32[2,8,128], index: 4, kind: output, shape index: {}]  }
   0x1   :  { %1025 = sst [smem:[#allocation18_spill]] %s1016_s2  ;;  %s9_s17 = sshll.u32 %s1014_s0, 4  ;;  %s10_s17 = int_to_ptr.vmem [resolvable:$true] %s9_s17 }
   0x2   :  { %13 = sst [smem:[#allocation4]] %s1015_s1  ;;  %s496_s20 = scalar_lea.vmem %s10_s17, 16 }
   0x3   :  { %p497_p0 = scmp.ne.s32.totalorder %s10_s17, %s496_s20  ;;  %p501_p1 = scmp.lt.s32.totalorder %s10_s17, %s10_s17 }
   0x4   :  { %p502_p2 = scmp.lt.s32.totalorder %s496_s20, %s496_s20 }
   0x6   :  { %p503_p3 = por %p502_p2, %p501_p1 }
   0x8   :  { %p504_p4 = pnand %p503_p3, %p497_p0 }
   0xa   :  { %507 = shalt.err (!%p504_p4)  }
   0xb   :  { %s682_s21 = smov [#allocation3]  }
   0xc   :  { %12 = dma.vmem_to_smem %s10_s17, 16, %s682_s21, [#allocation2] }
   0xd   :  { %632 = dma.done.wait [#allocation2], 16 }
   0xe   :  { %633 = vsyncadd [#allocation2], 4294967280 }
   0xf   :  { %15 = sfence }
  0x10   :  { %16 = vsyncpa [#allocation6], 0 }
  0x11   :  { %18 = vsyncpa [#allocation6 + $0x1], 0 }
  0x12   :  { %19 = vsyncpa [#allocation9], 0 }
  0x13   :  { %21 = vsyncpa [#allocation9 + $0x1], 0 }
  0x14   :  { %22 = vsyncpa [#allocation7], 0 }
  0x15   :  { %24 = vsyncpa [#allocation7 + $0x1], 0  ;;  %s717_s0 = smov 0   ;;  %s719_s1 = smov 0  }
  0x16   :  { %s721_s22 = smov 0   ;;  %s723_s23 = smov 0  }
  0x17   :  { %s725_s24 = smov 0   ;;  %s727_s25 = smov 0  }
  0x18   :  { %s729_s26 = smov 0   ;;  %s731_s27 = smov 0  }
  0x19   :  { %s733_s28 = smov 0  }
  0x1a LB: > { %s384_s29 = sadd.s32 4294967295, %s680_s28   ;;  %s385_s30 = sadd.s32 4294967294, %s680_s28   ;;  %s680_s28 = sphi %s733_s28, %s30_s28   ;;  %s676_s27 = sphi %s731_s27, %s1056_s27   ;;  %s672_s26 = sphi %s729_s26, %s1055_s26   ;;  %s668_s25 = sphi %s727_s25, %s1054_s25   ;;  %s664_s24 = sphi %s725_s24, %s1053_s24   ;;  %s660_s23 = sphi %s723_s23, %s1052_s23   ;;  %s656_s22 = sphi %s721_s22, %s1051_s22   ;;  %s652_s1 = sphi %s719_s1, %s1050_s1   ;;  %s648_s0 = sphi %s717_s0, %s1049_s0  }
  0x1b   : > { %s42_s5 = sadd.s32 1, %s676_s27  ;;  %s72_s6 = sadd.s32 1, %s668_s25 }
  0x1c   : > { %p44_p5 = scmp.ge.s32.totalorder %s42_s5, 2  ;;  %p79_p6 = scmp.ne.s32.totalorder %s668_s25, %s664_s24 }
  0x1d   : > { %p1020_p7 = scmp.eq.s32.totalorder %s680_s28, 0  ;;  %p85_p8 = scmp.ne.s32.totalorder %s664_s24, %s660_s23 }
  0x1e   : > { %s1058_s5 = smov (%p44_p5, %s42_s5), 0  ;;  %p782_p10 = scmp.eq.s32.totalorder %s384_s29, 0 }
  0x1f   : > { %1026 = sst [smem:[#allocation17_spill]] %s1058_s5  ;;  %p778_p9 = por %p1020_p7, %p79_p6 }
  0x20   : > { %s67_s9 = ssub.s32 %s676_s27, %s1058_s5  ;;  %s789_s10 = sld [smem:[#allocation3 + %s676_s27]] }
  0x21   : > { %p70_p11 = scmp.eq.s32.totalorder %s67_s9, 0  ;;  %p796_p12 = por %p782_p10, %p85_p8 }
  0x22   : > { %s801_s12 = sld [smem:[#allocation3 + %s1058_s5]]  ;;  %p141_p13 = scmp.eq.s32.totalorder %s384_s29, 1 }
  0x23   : > { %s1029_s11 = scalar_select %p796_p12, 1, 0 }
  0x24   : > { %s804_s13 = scalar_select %p70_p11, %s668_s25, %s72_s6  }
  0x25   : > { %p809_p0 = por %p141_p13, %p79_p6  ;;  %p147_p1 = scmp.eq.s32.totalorder %s385_s30, 1 }
  0x26   : > { %p1019_p3 = scmp.lt.s32.totalorder %s680_s28, 2  ;;  %s170_s16 = sand.u32 1, %s668_s25  }
  0x27   : > { %s1030_s14 = scalar_select %p809_p0, 1, 0 }
  0x28   : > { %p818_p4 = por %p147_p1, %p85_p8  ;;  %s388_s17 = sshll.u32 %s170_s16, 3 }
  0x29   : > { %s389_s18 = sshll.u32 %s676_s27, 7  ;;  %s1032_s2 = sld [smem:[#allocation18_spill]] }
  0x2a   : > { %s1031_s15 = scalar_select %p818_p4, 1, 0 }
  0x2b   : > { %s174_s29 = scalar_lea.vmem [#allocation5], %s388_s17  ;;  %p835_p5 = pnand %p1019_p3, %p778_p9 }
  0x2c   : > { %s182_s30 = sshll.u32 %s174_s29, 4  ;;  %s171_s9 = scalar_lea.sflag [#allocation6], %s170_s16  ;;  %s829_s30 = int_to_ptr.vmem [resolvable:$true] %s182_s30 }
  0x2d   : > { %p510_p13 = pneg %p835_p5 }
  0x2f   : > { %s827_s21 = scalar_lea.hbm %s1032_s2, %s389_s18  ;;  %s513_s19 = scalar_lea.hbm %s1032_s2, 256 }
  0x30   : > { %s508_s18 = scalar_lea.hbm %s827_s21, 128  ;;  %p514_p9 = scmp.lt.u32.totalorder %s827_s21, %s1032_s2 }
  0x31   : > { %p509_p11 = scmp.ne.s32.totalorder %s827_s21, %s508_s18  ;;  %p515_p3 = scmp.lt.u32.totalorder %s513_s19, %s508_s18 }
  0x32   : > { %p517_p6 = scmp.lt.u32.totalorder %s508_s18, %s827_s21 }
  0x33   : > { %p511_p1 = pnand %p510_p13, %p509_p11  ;;  %p516_p7 = por %p515_p3, %p514_p9 }
  0x35   : > { %p512_p2 = pneg %p511_p1  ;;  %p518_p8 = por %p517_p6, %p516_p7 }
  0x37   : > { %p519_p4 = pnand %p518_p8, %p512_p2 }
  0x39   : > { %522 = shalt.err (!%p519_p4)
}
  0x3a   : > { %s523_s16 = scalar_lea.vmem %s829_s30, 128  ;;  %s683_s17 = smov [#allocation5]  }
  0x3b   : > { %p524_p11 = scmp.ne.s32.totalorder %s829_s30, %s523_s16  ;;  %s528_s7 = sshll.u32 %s683_s17, 4  ;;  %s529_s7 = int_to_ptr.vmem [resolvable:$false] %s528_s7 }
  0x3c   : > { %s530_s20 = scalar_lea.vmem %s529_s7, 256  ;;  %p531_p12 = scmp.lt.s32.totalorder %s829_s30, %s529_s7 }
  0x3d   : > { %p526_p1 = pnand %p524_p11, %p510_p13  ;;  %p532_p3 = scmp.lt.s32.totalorder %s530_s20, %s523_s16 }
  0x3f   : > { %p527_p0 = pneg %p526_p1  ;;  %p533_p9 = por %p532_p3, %p531_p12 }
  0x41   : > { %p534_p7 = pnand %p533_p9, %p527_p0 }
  0x43   : > { %537 = shalt.err (!%p534_p7)
}
  0x44   : > { %411 = dma.hbm_to_vmem [thread:$0]  (!%p835_p5), %s827_s21, 128, %s829_s30, %s171_s9  }
  0x45   : > { %p1034_p12 = scmp.lt.s32.totalorder %s680_s28, 3  ;;  %p1035_p0 = scmp.ge.s32.totalorder %s680_s28, 1 }
  0x46   : > { %s97_s18 = ssub.s32 %s789_s10, %s801_s12  ;;  %s102_s19 = sadd.s32 1, %s656_s22 }
  0x47   : > { %p870_p2 = pnand %p1035_p0, %p1034_p12  ;;  %p100_p4 = scmp.eq.s32.totalorder %s97_s18, 0 }
  0x48   : > { %p109_p6 = scmp.ne.s32.totalorder %s656_s22, %s652_s1  ;;  %p115_p8 = scmp.ne.s32.totalorder %s652_s1, %s648_s0 }
  0x49   : > { %s189_s29 = sand.u32 1, %s656_s22   ;;  %p1037_p13 = scmp.eq.s32.totalorder %s680_s28, 0 }
  0x4a   : > { %s883_s16 = scalar_select %p100_p4, %s656_s22, %s102_s19  }
  0x4b   : > { %p111_p11 = por %p109_p6, %p1037_p13  ;;  %p889_p1 = por %p115_p8, %p782_p10 }
  0x4c   : > { %s390_s30 = sshll.u32 %s189_s29, 3  ;;  %p1039_p5 = scmp.lt.s32.totalorder %s680_s28, 2 }
  0x4d   : > { %s1038_s21 = scalar_select %p889_p1, 1, 0 }
  0x4e   : > { %p895_p3 = pnand %p1039_p5, %p111_p11  ;;  %p1041_p9 = pmov %p1039_p5 }
  0x4f   : > { %s401_s10 = scalar_select %p111_p11, [#allocation3], [#allocation11] }
  0x50   : > { %s402_s0 = scalar_select %p111_p11, %s676_s27, 0 }
  0x51   : > { %s1060_s10 = smov (!%p1041_p9, %s401_s10), [#allocation12]  ;;  %p1042_p7 = pmov %p1039_p5 }
  0x52   : > { %s193_s8 = scalar_lea.vmem [#allocation8], %s390_s30  ;;  %s190_s2 = scalar_lea.sflag [#allocation9], %s189_s29 }
  0x53   : > { %s1062_s0 = smov (!%p1042_p7, %s402_s0), 0  ;;  %s202_s17 = sshll.u32 %s193_s8, 4  ;;  %s904_s17 = int_to_ptr.vmem [resolvable:$true] %s202_s17 }
  0x54   : > { %s194_s12 = sld [smem:[%s1060_s10 + %s1062_s0]]  ;;  %p540_p12 = pneg %p895_p3 }
  0x55   : > { %s543_s0 = scalar_lea.hbm %s1017_s3, 256 }
  0x5a   : > { %s391_s7 = sshll.u32 %s194_s12, 7 }
  0x5b   : > { %s909_s19 = scalar_lea.hbm %s1017_s3, %s391_s7 }
  0x5c   : > { %s538_s5 = scalar_lea.hbm %s909_s19, 128  ;;  %p544_p6 = scmp.lt.u32.totalorder %s909_s19, %s1017_s3 }
  0x5d   : > { %p539_p10 = scmp.ne.s32.totalorder %s909_s19, %s538_s5  ;;  %p545_p8 = scmp.lt.u32.totalorder %s543_s0, %s538_s5 }
  0x5e   : > { %p547_p11 = scmp.lt.u32.totalorder %s538_s5, %s909_s19 }
  0x5f   : > { %p541_p0 = pnand %p540_p12, %p539_p10  ;;  %p546_p13 = por %p545_p8, %p544_p6 }
  0x61   : > { %p542_p4 = pneg %p541_p0  ;;  %p548_p5 = por %p547_p11, %p546_p13 }
  0x63   : > { %p549_p9 = pnand %p548_p5, %p542_p4 }
  0x65   : > { %552 = shalt.err (!%p549_p9)
}
  0x66   : > { %s553_s29 = scalar_lea.vmem %s904_s17, 128  ;;  %s684_s7 = smov [#allocation8]  }
  0x67   : > { %p554_p7 = scmp.ne.s32.totalorder %s904_s17, %s553_s29  ;;  %s558_s20 = sshll.u32 %s684_s7, 4  ;;  %s559_s20 = int_to_ptr.vmem [resolvable:$false] %s558_s20 }
  0x68   : > { %s560_s18 = scalar_lea.vmem %s559_s20, 256  ;;  %p561_p1 = scmp.lt.s32.totalorder %s904_s17, %s559_s20 }
  0x69   : > { %p556_p10 = pnand %p554_p7, %p540_p12  ;;  %p562_p6 = scmp.lt.s32.totalorder %s560_s18, %s553_s29 }
  0x6b   : > { %p557_p0 = pneg %p556_p10  ;;  %p563_p8 = por %p562_p6, %p561_p1 }
  0x6d   : > { %p564_p13 = pnand %p563_p8, %p557_p0 }
  0x6f   : > { %567 = shalt.err (!%p564_p13)
}
  0x70   : > { %416 = dma.hbm_to_vmem [thread:$0]  (!%p895_p3), %s909_s19, 128, %s904_s17, %s190_s2  }
  0x71   : > { %211 = sbr.rel (%p870_p2) target bundleno = 152 (0x98), region = 32  ;;  %s939_s5 = sand.u32 (!%p870_p2), 1, %s664_s24  }
  0x72   : > { %s393_s30 = sshll.u32 (!%p870_p2), %s939_s5, 3  ;;  %s214_s10 = scalar_lea.sflag (!%p870_p2), [#allocation6], %s939_s5 }
  0x73   : > { %s217_s0 = scalar_lea.vmem (!%p870_p2), [#allocation5], %s393_s30  ;;  %p1043_p1 = scmp.ne.s32.totalorder (!%p870_p2), %s1029_s11, 0 }
  0x78   : > { %635 = dma.done.wait (%p1043_p1), %s214_s10, 128  }
  0x79   : > { %637 = vsyncadd (%p1043_p1), %s214_s10, 4294967168  ;;  %s222_s2 = sand.u32 1, %s652_s1   ;;  %p1044_p2 = scmp.ne.s32.totalorder %s1038_s21, 0 }
  0x7a   : > { %s394_s9 = sshll.u32 %s222_s2, 3  ;;  %s223_s6 = scalar_lea.sflag [#allocation9], %s222_s2 }
  0x7b   : > { %s226_s17 = scalar_lea.vmem [#allocation8], %s394_s9 }
  0x7c   : > { %639 = dma.done.wait (%p1044_p2), %s223_s6, 128  }
  0x7d   : > { %641 = vsyncadd (%p1044_p2), %s223_s6, 4294967168  ;;  %s255_s19 = sld [smem:[#allocation4]]  ;;  %v256_v0 = vld [vmem:[%s217_s0] sm:$0xff]  ;;  %v257_v1 = vld [vmem:[%s226_s17] sm:$0xff]  ;;  %s253_s12 = scalar_lea.vmem [#allocation10], %s393_s30 }
  0x7e   : > { %s280_s8 = sshll.u32 %s253_s12, 4  ;;  %s397_s29 = sshll.u32 %s672_s26, 7  ;;  %s953_s8 = int_to_ptr.vmem [resolvable:$true] %s280_s8 }
  0x7f   : > { %s958_s20 = scalar_lea.hbm %s1018_s4, %s397_s29  ;;  %s266_s18 = scalar_lea.sflag [#allocation7], %s939_s5 }
  0x80   : > { %s568_s10 = scalar_lea.vmem %s953_s8, 128  ;;  %p1045_p12 = scmp.ne.s32.totalorder %s1030_s14, 0 }
  0x81   : > { %p569_p3 = scmp.ne.s32.totalorder %s953_s8, %s568_s10  ;;  %s685_s26 = smov [#allocation10]  }
  0x82   : > { %s572_s30 = sshll.u32 %s685_s26, 4  ;;  %s573_s30 = int_to_ptr.vmem [resolvable:$false] %s572_s30 }
  0x83   : > { %v258_v2 = vstv %s255_s19  ;;  %s260_s11 = ssub.f32 1.0, %s255_s19  ;;  %p570_p4 = pnand %p569_p3, %p1045_p12 }
  0x84   : > { %v259_v3 = vmul.f32 %v258_v2, %v256_v0  ;;  %s574_s0 = scalar_lea.vmem %s573_s30, 256  ;;  %p575_p5 = scmp.lt.s32.totalorder %s953_s8, %s573_s30 }
  0x85   : > { %v261_v4 = vstv %s260_s11  ;;  %p571_p11 = pneg %p570_p4  ;;  %p576_p9 = scmp.lt.s32.totalorder %s574_s0, %s568_s10 }
  0x86   : > { %v262_v5 = vmul.f32 %v261_v4, %v257_v1 }
  0x87   : > { %p577_p7 = por %p576_p9, %p575_p5 }
  0x88   : > { %v263_v6 = vadd.f32 %v262_v5, %v259_v3 }
  0x89   : > { %p578_p10 = pnand %p577_p7, %p571_p11 }
  0x8a   : > { %264 = vst [vmem:[%s253_s12] sm:$0xff] %v263_v6 }
  0x8b   : > { %581 = shalt.err (!%p578_p10)
}
  0x8c   : > { %s582_s5 = scalar_lea.hbm %s958_s20, 128  ;;  %s586_s6 = scalar_lea.hbm %s1018_s4, 256 }
  0x8d   : > { %p583_p0 = scmp.ne.s32.totalorder %s958_s20, %s582_s5  ;;  %p587_p13 = scmp.lt.u32.totalorder %s958_s20, %s1018_s4 }
  0x8e   : > { %p588_p1 = scmp.lt.u32.totalorder %s586_s6, %s582_s5  ;;  %p590_p3 = scmp.lt.u32.totalorder %s582_s5, %s958_s20 }
  0x8f   : > { %p584_p6 = pnand %p583_p0, %p1045_p12 }
  0x90   : > { %p589_p2 = por %p588_p1, %p587_p13 }
  0x91   : > { %p585_p8 = pneg %p584_p6 }
  0x92   : > { %p591_p4 = por %p590_p3, %p589_p2 }
  0x94   : > { %p592_p11 = pnand %p591_p4, %p585_p8 }
  0x96   : > { %595 = shalt.err (!%p592_p11)
}
  0x97   : > { %406 = dma.vmem_to_hbm [thread:$0]  (%p1045_p12), %s953_s8, 128, %s958_s20, %s266_s18  }
  0x98 PF: > { %s292_s11 = sand.u32 1, %s660_s23   ;;  %p1046_p5 = scmp.ne.s32.totalorder %s1031_s15, 0 }
  0x99   : > { %p1047_p9 = scmp.ge.s32.totalorder %s680_s28, 2  ;;  %s293_s12 = scalar_lea.sflag [#allocation7], %s292_s11 }
  0x9b   : > { %p418_p7 = pnand %p1047_p9, %p1046_p5 }
  0x9d   : > { %643 = dma.done.wait (!%p418_p7), %s293_s12, 128  }
  0x9e   : > { %645 = vsyncadd (!%p418_p7), %s293_s12, 4294967168  ;;  %s30_s28 = sadd.s32 1, %s680_s28   ;;  %s1048_s14 = sld [smem:[#allocation17_spill]] }
  0x9f   : > { %p27_p10 = scmp.ge.s32.totalorder %s30_s28, 4   ;;  %s1049_s0 = smov %s652_s1 }
  0xa0   : > { %s1050_s1 = smov %s656_s22  ;;  %s1051_s22 = smov %s883_s16 }
  0xa1   : > { %s1052_s23 = smov %s664_s24  ;;  %s1053_s24 = smov %s668_s25 }
  0xa2   : > { %s1054_s25 = smov %s804_s13  ;;  %s1055_s26 = smov %s676_s27 }
  0xa3   :  { %29 = sbr.rel (!%p27_p10) target bundleno = 26 (0x1a), region = 90 }
  0xa4   : > { %s1056_s27 = smov %s1048_s14 }
  0xaa   :  { %298 = vsyncpa [#allocation6], 1 }
  0xab   :  { %300 = vsyncpa [#allocation6 + $0x1], 1 }
  0xac   :  { %301 = vsyncpa [#allocation9], 1 }
  0xad   :  { %303 = vsyncpa [#allocation9 + $0x1], 1 }
  0xae   :  { %304 = vsyncpa [#allocation7], 1 }
  0xaf   :  { %306 = vsyncpa [#allocation7 + $0x1], 1 }

</bundles_post_ra>
